<compile_context>
chip_gen: v7x
topology: tpu7x:2x2x1
jax: 0.10.0
libtpu: 0.0.40
codegen_flags: <defaults>
</compile_context>

<pallas_src>
import jax
import jax.numpy as jnp
from jax.experimental import pallas as pl
from jax.experimental.pallas import tpu as pltpu


# ---------------------------------------------------------------------------
# Kernel
# ---------------------------------------------------------------------------
def _redq_fused_kernel(obs_ref, act_ref, w1o_ref, w1a_ref, b1_ref,
                       w2_ref, b2_ref, w3_ref, b3_ref, out_ref):
    # obs_ref: (B, obs_dim) f32       act_ref: (B, act_dim) f32
    # w1o_ref: (obs_dim, E*H) bf16    w1a_ref: (act_dim, E*H) bf16
    # b1_ref:  (1, E*H) f32
    # w2_ref:  (E*H, E*H) bf16 block-diag     b2_ref: (1, E*H) f32
    # w3_ref:  (E*H, E)   bf16 block-diag     b3_ref: (1, E)   f32
    # out_ref: (B, E) f32 (lane-dense)
    wdt = w1o_ref.dtype  # bf16 operands -> native MXU path, f32 accumulation

    h1 = jnp.dot(obs_ref[...].astype(wdt), w1o_ref[...],
                 preferred_element_type=jnp.float32)
    h1 = h1 + jnp.dot(act_ref[...].astype(wdt), w1a_ref[...],
                      preferred_element_type=jnp.float32)
    h1 = jnp.maximum(h1 + b1_ref[...], 0.0)

    h2 = jnp.dot(h1.astype(wdt), w2_ref[...],
                 preferred_element_type=jnp.float32)
    h2 = jnp.maximum(h2 + b2_ref[...], 0.0)

    q = jnp.dot(h2.astype(wdt), w3_ref[...],
                preferred_element_type=jnp.float32) + b3_ref[...]
    out_ref[...] = q.astype(out_ref.dtype)


# ---------------------------------------------------------------------------
# One-time weight packing (NOT in the per-call hot path)
# ---------------------------------------------------------------------------
def prepare_params(params, obs_dim, weight_dtype=jnp.bfloat16):
    """Pack stacked ensemble weights into lane-dense kernel operands.

    Run once at init / after each optimizer update, not per forward.
    params: dict with stacked ensemble weights
        w1 (E, D, H), b1 (E, 1, H), w2 (E, H, H), b2 (E, 1, H),
        w3 (E, H, 1), b3 (E, 1, 1)   where D = obs_dim + act_dim.
    """
    w1, b1, w2, b2, w3, b3 = (params["w1"], params["b1"], params["w2"],
                              params["b2"], params["w3"], params["b3"])
    E, D, H = w1.shape
    EH = E * H
    f32 = jnp.float32

    # W1_cat[d, e*H + h] = w1[e, d, h]; split rows into obs / act halves.
    w1_cat = jnp.transpose(w1.astype(f32), (1, 0, 2)).reshape(D, EH)

    eye = jnp.eye(E, dtype=f32)
    # W2_bd[e*H + h, f*H + k] = w2[e, h, k] * delta(e, f)
    w2_bd = (w2.astype(f32)[:, :, None, :] * eye[:, None, :, None]).reshape(EH, EH)
    # W3_cat[e*H + h, f] = w3[e, h, 0] * delta(e, f)
    w3_cat = (w3.astype(f32)[:, :, 0][:, :, None] * eye[:, None, :]).reshape(EH, E)

    return {
        "w1_obs": w1_cat[:obs_dim].astype(weight_dtype),
        "w1_act": w1_cat[obs_dim:].astype(weight_dtype),
        "b1": b1.astype(f32).reshape(1, EH),
        "w2_bd": w2_bd.astype(weight_dtype),
        "b2": b2.astype(f32).reshape(1, EH),
        "w3_cat": w3_cat.astype(weight_dtype),
        "b3": b3.astype(f32).reshape(1, E),
    }


# ---------------------------------------------------------------------------
# Forward wrappers
# ---------------------------------------------------------------------------
def redq_critic_forward_lane_dense(obs, act, packed):
    """Returns the lane-dense (B, E) q-value slab (preferred for downstream
    min/mean-over-ensemble reductions)."""
    w1_obs, w1_act = packed["w1_obs"], packed["w1_act"]
    w2_bd, w3_cat = packed["w2_bd"], packed["w3_cat"]
    b1, b2, b3 = packed["b1"], packed["b2"], packed["b3"]

    B = obs.shape[0]
    obs_dim = w1_obs.shape[0]
    act_dim = w1_act.shape[0]
    EH = w2_bd.shape[0]
    E = w3_cat.shape[1]
    f32 = jnp.float32

    obs = obs.astype(f32)
    act = act.astype(f32)

    flops = 2 * B * ((obs_dim + act_dim) * EH + EH * EH + EH * E)
    bytes_accessed = int(
        B * (obs_dim + act_dim + E) * 4
        + sum(int(p.size) * p.dtype.itemsize
              for p in (w1_obs, w1_act, b1, w2_bd, b2, w3_cat, b3)))

    vmem_spec = pl.BlockSpec(memory_space=pltpu.MemorySpace.VMEM)
    return pl.pallas_call(
        _redq_fused_kernel,
        out_shape=jax.ShapeDtypeStruct((B, E), f32),
        in_specs=[vmem_spec] * 9,
        out_specs=vmem_spec,
        cost_estimate=pl.CostEstimate(flops=flops, transcendentals=0,
                                      bytes_accessed=bytes_accessed),
    )(obs, act, w1_obs, w1_act, b1, w2_bd, b2, w3_cat, b3)


def redq_critic_forward(obs, act, packed):
    """API-compatible output: (E, B, 1), matching torch.stack([...], dim=0)."""
    q_be = redq_critic_forward_lane_dense(obs, act, packed)
    return jnp.transpose(q_be, (1, 0))[:, :, None]


# ---------------------------------------------------------------------------
# Init + pure-JAX reference
# ---------------------------------------------------------------------------
def init_params(key, ensemble_size, obs_dim, act_dim, hidden):
    """Deterministic init mimicking PyTorch nn.Linear default
    (U[-1/sqrt(fan_in), 1/sqrt(fan_in)])."""
    D = obs_dim + act_dim
    ks = jax.random.split(key, 6)

    def u(k, shape, fan_in):
        bound = 1.0 / jnp.sqrt(fan_in)
        return jax.random.uniform(k, shape, jnp.float32, -bound, bound)

    return {
        "w1": u(ks[0], (ensemble_size, D, hidden), D),
        "b1": u(ks[1], (ensemble_size, 1, hidden), D),
        "w2": u(ks[2], (ensemble_size, hidden, hidden), hidden),
        "b2": u(ks[3], (ensemble_size, 1, hidden), hidden),
        "w3": u(ks[4], (ensemble_size, hidden, 1), hidden),
        "b3": u(ks[5], (ensemble_size, 1, 1), hidden),
    }


def _reference_forward(obs, act, params):
    """Pure-JAX f32 reference of the ensemble MLP (for correctness check)."""
    x = jnp.concatenate([obs, act], axis=-1).astype(jnp.float32)
    h1 = jnp.maximum(jnp.einsum("bd,edh->ebh", x, params["w1"]) + params["b1"], 0.0)
    h2 = jnp.maximum(jnp.einsum("ebh,ehk->ebk", h1, params["w2"]) + params["b2"], 0.0)
    q = jnp.einsum("ebh,eho->ebo", h2, params["w3"]) + params["b3"]
    return q  # (E, B, 1)


if __name__ == "__main__":
    ENSEMBLE_SIZE = 10
    BATCH = 8
    OBS_DIM = 12
    ACT_DIM = 4
    HIDDEN = 32

    key = jax.random.PRNGKey(0)
    k_obs, k_act, k_params = jax.random.split(key, 3)

    obs = jax.random.normal(k_obs, (BATCH, OBS_DIM), jnp.float32)
    act = jax.random.normal(k_act, (BATCH, ACT_DIM), jnp.float32)
    params = init_params(k_params, ENSEMBLE_SIZE, OBS_DIM, ACT_DIM, HIDDEN)

    # One-time packing (hoisted out of the per-call hot path).
    packed = prepare_params(params, OBS_DIM)

    fwd = jax.jit(redq_critic_forward)
    q_values = jax.block_until_ready(fwd(obs, act, packed))

    assert q_values.shape == (ENSEMBLE_SIZE, BATCH, 1), q_values.shape

    # bf16 packed weights -> relaxed tolerance vs the f32 reference.
    q_ref = _reference_forward(obs, act, params)
    max_err = float(jnp.max(jnp.abs(q_values - q_ref)))
    assert max_err < 3e-2, max_err

    print("KERNEL_OK")
</pallas_src>

<mosaic_0001>
module attributes {stable_mosaic.version = 11 : i64} {
  func.func @_redq_fused_kernel(%arg0: memref<8x12xf32, #tpu.memory_space<vmem>>, %arg1: memref<8x4xf32, #tpu.memory_space<vmem>>, %arg2: memref<12x320xbf16, #tpu.memory_space<vmem>>, %arg3: memref<4x320xbf16, #tpu.memory_space<vmem>>, %arg4: memref<1x320xf32, #tpu.memory_space<vmem>>, %arg5: memref<320x320xbf16, #tpu.memory_space<vmem>>, %arg6: memref<1x320xf32, #tpu.memory_space<vmem>>, %arg7: memref<320x10xbf16, #tpu.memory_space<vmem>>, %arg8: memref<1x10xf32, #tpu.memory_space<vmem>>, %arg9: memref<8x10xf32, #tpu.memory_space<vmem>>) attributes {dimension_semantics = [], scalar_prefetch = 0 : i64, scratch_operands = 0 : i64, tpu.core_type = #tpu.core_type<tc>} {
    %c0 = arith.constant 0 : index
    %c0_0 = arith.constant 0 : index
    %0 = vector.load %arg0[%c0, %c0_0] : memref<8x12xf32, #tpu.memory_space<vmem>>, vector<8x12xf32>
    %1 = arith.truncf %0 : vector<8x12xf32> to vector<8x12xbf16>
    %c0_1 = arith.constant 0 : index
    %c0_2 = arith.constant 0 : index
    %2 = vector.load %arg2[%c0_1, %c0_2] : memref<12x320xbf16, #tpu.memory_space<vmem>>, vector<12x320xbf16>
    %cst = arith.constant dense<0.000000e+00> : vector<8x320xf32>
    %3 = tpu.matmul %1, %2, %cst {dimension_numbers = #tpu.dot_dimension_numbers<[1], [0], [0], [1], [0, 0, 1, 1], [], []>} : vector<8x12xbf16>, vector<12x320xbf16>, vector<8x320xf32> -> vector<8x320xf32>
    %c0_3 = arith.constant 0 : index
    %c0_4 = arith.constant 0 : index
    %4 = vector.load %arg1[%c0_3, %c0_4] : memref<8x4xf32, #tpu.memory_space<vmem>>, vector<8x4xf32>
    %5 = arith.truncf %4 : vector<8x4xf32> to vector<8x4xbf16>
    %c0_5 = arith.constant 0 : index
    %c0_6 = arith.constant 0 : index
    %6 = vector.load %arg3[%c0_5, %c0_6] : memref<4x320xbf16, #tpu.memory_space<vmem>>, vector<4x320xbf16>
    %cst_7 = arith.constant dense<0.000000e+00> : vector<8x320xf32>
    %7 = tpu.matmul %5, %6, %cst_7 {dimension_numbers = #tpu.dot_dimension_numbers<[1], [0], [0], [1], [0, 0, 1, 1], [], []>} : vector<8x4xbf16>, vector<4x320xbf16>, vector<8x320xf32> -> vector<8x320xf32>
    %8 = arith.addf %3, %7 : vector<8x320xf32>
    %c0_8 = arith.constant 0 : index
    %c0_9 = arith.constant 0 : index
    %9 = vector.load %arg4[%c0_8, %c0_9] : memref<1x320xf32, #tpu.memory_space<vmem>>, vector<1x320xf32>
    %10 = vector.broadcast %9 : vector<1x320xf32> to vector<8x320xf32>
    %11 = arith.addf %8, %10 : vector<8x320xf32>
    %cst_10 = arith.constant 0.000000e+00 : f32
    %12 = vector.broadcast %cst_10 : f32 to vector<8x320xf32>
    %13 = arith.maximumf %11, %12 : vector<8x320xf32>
    %14 = arith.truncf %13 : vector<8x320xf32> to vector<8x320xbf16>
    %c0_11 = arith.constant 0 : index
    %c0_12 = arith.constant 0 : index
    %15 = vector.load %arg5[%c0_11, %c0_12] : memref<320x320xbf16, #tpu.memory_space<vmem>>, vector<320x320xbf16>
    %cst_13 = arith.constant dense<0.000000e+00> : vector<8x320xf32>
    %16 = tpu.matmul %14, %15, %cst_13 {dimension_numbers = #tpu.dot_dimension_numbers<[1], [0], [0], [1], [0, 0, 1, 1], [], []>} : vector<8x320xbf16>, vector<320x320xbf16>, vector<8x320xf32> -> vector<8x320xf32>
    %c0_14 = arith.constant 0 : index
    %c0_15 = arith.constant 0 : index
    %17 = vector.load %arg6[%c0_14, %c0_15] : memref<1x320xf32, #tpu.memory_space<vmem>>, vector<1x320xf32>
    %18 = vector.broadcast %17 : vector<1x320xf32> to vector<8x320xf32>
    %19 = arith.addf %16, %18 : vector<8x320xf32>
    %cst_16 = arith.constant 0.000000e+00 : f32
    %20 = vector.broadcast %cst_16 : f32 to vector<8x320xf32>
    %21 = arith.maximumf %19, %20 : vector<8x320xf32>
    %22 = arith.truncf %21 : vector<8x320xf32> to vector<8x320xbf16>
    %c0_17 = arith.constant 0 : index
    %c0_18 = arith.constant 0 : index
    %23 = vector.load %arg7[%c0_17, %c0_18] : memref<320x10xbf16, #tpu.memory_space<vmem>>, vector<320x10xbf16>
    %cst_19 = arith.constant dense<0.000000e+00> : vector<8x10xf32>
    %24 = tpu.matmul %22, %23, %cst_19 {dimension_numbers = #tpu.dot_dimension_numbers<[1], [0], [0], [1], [0, 0, 1, 1], [], []>} : vector<8x320xbf16>, vector<320x10xbf16>, vector<8x10xf32> -> vector<8x10xf32>
    %c0_20 = arith.constant 0 : index
    %c0_21 = arith.constant 0 : index
    %25 = vector.load %arg8[%c0_20, %c0_21] : memref<1x10xf32, #tpu.memory_space<vmem>>, vector<1x10xf32>
    %26 = vector.broadcast %25 : vector<1x10xf32> to vector<8x10xf32>
    %27 = arith.addf %24, %26 : vector<8x10xf32>
    %c0_22 = arith.constant 0 : index
    %c0_23 = arith.constant 0 : index
    %28 = vector.load %arg9[%c0_22, %c0_23] : memref<8x10xf32, #tpu.memory_space<vmem>>, vector<8x10xf32>
    tpu.vector_store %arg9[%c0_22, %c0_23], %27 {strides = array<i32>} : memref<8x10xf32, #tpu.memory_space<vmem>>, vector<8x10xf32>,
    return
  }
}

</mosaic_0001>

<bundles_post_ra>
// kernel: redq_critic_forward.1
= control target key start
LH: loop header
LB: loop body
LE: loop exit
PB: predicated region body
PF: predicated region fallthrough
CT: control target
= control target key end

     0   :  { %14 = vsyncpa [#allocation3], 0  ;;  %s1734_s0 = inlined_call_operand.vmem [shape: f32[8,12], index: 0, kind: input, shape index: {}]   ;;  %s1735_s1 = inlined_call_operand.vmem [shape: f32[8,4], index: 1, kind: input, shape index: {}]   ;;  %s1736_s2 = inlined_call_operand.vmem [shape: bf16[12,320], index: 2, kind: input, shape index: {}]   ;;  %s1737_s3 = inlined_call_operand.vmem [shape: bf16[4,320], index: 3, kind: input, shape index: {}]   ;;  %s1738_s4 = inlined_call_operand.vmem [shape: f32[1,320], index: 4, kind: input, shape index: {}]   ;;  %s1739_s5 = inlined_call_operand.hbm [shape: bf16[320,320], index: 5, kind: input, shape index: {}]   ;;  %s1740_s6 = inlined_call_operand.vmem [shape: f32[1,320], index: 6, kind: input, shape index: {}]   ;;  %s1741_s7 = inlined_call_operand.vmem [shape: bf16[320,10], index: 7, kind: input, shape index: {}]   ;;  %s1742_s8 = inlined_call_operand.vmem [shape: f32[1,10], index: 8, kind: input, shape index: {}]   ;;  %s1743_s9 = inlined_call_operand.hbm [shape: f32[8,10], index: 9, kind: output, shape index: {}]  }
   0x1   :  { %15 = vsyncpa [#allocation4], 0  ;;  %s1513_s30 = smov [#allocation2]   ;;  %s1465_s13 = scalar_lea.hbm %s1739_s5, 7680 }
   0x2   :  { %s31_s10 = sshll.u32 %s1513_s30, 4  ;;  %p1466_p0 = scmp.ne.s32.totalorder %s1739_s5, %s1465_s13  ;;  %s32_s10 = int_to_ptr.vmem [resolvable:$true] %s31_s10 }
   0x3   :  { %p1469_p1 = scmp.lt.u32.totalorder %s1465_s13, %s1739_s5 }
   0x5   :  { %p1471_p2 = pnand %p1469_p1, %p1466_p0 }
   0x7   :  { %1474 = shalt.err (!%p1471_p2)
}
   0x8   :  { %s1475_s18 = scalar_lea.vmem %s32_s10, 7680  ;;  %p1480_p4 = scmp.lt.s32.totalorder %s32_s10, %s32_s10 }
   0x9   :  { %p1476_p3 = scmp.ne.s32.totalorder %s32_s10, %s1475_s18  ;;  %p1481_p5 = scmp.lt.s32.totalorder %s1475_s18, %s1475_s18 }
   0xb   :  { %p1482_p6 = por %p1481_p5, %p1480_p4 }
   0xd   :  { %p1483_p7 = pnand %p1482_p6, %p1476_p3 }
   0xf   :  { %1486 = shalt.err (!%p1483_p7)
}
  0x10   :  { %s1514_s19 = smov 192   ;;  %s1515_s20 = smov 12  }
  0x11   :  { %37 = dma.hbm_to_vmem [thread:$0]  %s1739_s5, 7680, %s32_s10, [#allocation3], %s1514_s19, %s1514_s19, %s1515_s20  }
  0x12   :  { %1509 = dma.done.wait [#allocation3], 7680  }
  0x13   :  { %1510 = vsyncadd [#allocation3], 4294959616  ;;  %v62_v0 = vlaneseq  ;;  %v1516_v1 = vmov 1983009808   ;;  %v1517_v4 = vmov 0   ;;  %vm186_vm0 = vcmask 1045504  }
  0x14   :  { %v60_v2 = vunpack.c.l.s4 %v1516_v1  ;;  %228 = vmatprep.mubr.bf16.mxu0 %v1517_v4  ;;  %120 = vmatprep.mubr.bf16.mxu1 %v1517_v4  ;;  %vm78_vm1 = vcmask 1041408   ;;  %v1360_v7 = vld [vmem:[%s1736_s2 + $0x4] ss:$12 sps:$4 sm:$0x3f]   ;;  %vm182_vm2 = vcmask 97280   ;;  %vm74_vm3 = vcmask 31744  }
  0x15   :  { %v1583_v3 = vshrl.u32 %v62_v0, 7  ;;  %v1362_v8 = vld [vmem:[%s1736_s2] ss:$12 sps:$4 sm:$0x3f]   ;;  %1165 = vmatprep.subr.msk.bf16.mxu0 %vm186_vm0, %v1360_v7  ;;  %v1367_v20 = vld [vmem:[#allocation2 + $0x4] ss:$12 sps:$4 sm:$0xff]  }
  0x16   :  { %v61_v5 = vunpack.c.0.s8 %v60_v2  ;;  %v56_v9 = vld [vmem:[%s1737_s3] sm:$0x3f]  ;;  %v188_v13 = vsel %vm186_vm0, %v1362_v8, 0  ;;  %v1370_v21 = vld [vmem:[#allocation2 + $0x1c] ss:$12 sps:$4 sm:$0xff]   ;;  %v1518_v23 = vmov 0.0  }
  0x17   :  { %v48_v10 = vld [vmem:[%s1734_s0] sm:$0xff]  ;;  %v58_v11 = vcombine.high %v56_v9, %v56_v9  ;;  %197 = vmatpush1.bf16.msra.mxu0 %v188_v13  ;;  %v1364_v27 = vld [vmem:[%s1736_s2 + $0x8] ss:$12 sps:$4 sm:$0x3f]   ;;  %vm1519_vm4 = vmmov 0   ;;  %v285_v13 = vsub.s32 1, %v1583_v3 }
  0x18   :  { %v64_v6 = vsub.s32 %v61_v5, %v1583_v3  ;;  %v49_v14 = vpack.c.bf16 %v48_v10, %v48_v10  ;;  %v54_v15 = vld [vmem:[%s1735_s1] sm:$0xff]  ;;  %724 = vmatprep.subr.bf16.mxu0 %v1367_v20  ;;  %v1371_v28 = vld [vmem:[#allocation2 + $0x30] ss:$12 sps:$4 sm:$0xff]   ;;  %v1376_v29 = vld [vmem:[#allocation2 + $0x4c] ss:$12 sps:$4 sm:$0xff]   ;;  %v194_v30 = vsel %vm186_vm0, %v1364_v27, 0 }
  0x19   :  { %v1365_v19 = vld [vmem:[#allocation2] ss:$12 sps:$4 sm:$0xff]   ;;  %v55_v22 = vpack.c.bf16 %v54_v15, %v54_v15  ;;  %v1368_v25 = vld [vmem:[#allocation2 + $0x18] ss:$12 sps:$4 sm:$0xff]   ;;  %v1374_v31 = vld [vmem:[#allocation2 + $0x48] ss:$12 sps:$4 sm:$0xff]  }
  0x1a   :  { %v65_v12 = vrot.slane %v56_v9, %v64_v6  ;;  %v72_v18 = vrot.slane %v58_v11, %v64_v6  ;;  %1166 = vmatmul.mubr.msk.bf16.vlgmr.msra.gmra.mrb[0].mxu0 %vm182_vm2, %v49_v14  ;;  %v1373_v26 = vld [vmem:[#allocation2 + $0x34] ss:$12 sps:$4 sm:$0xff]   ;;  %v1379_v33 = vld [vmem:[#allocation2 + $0x64] ss:$12 sps:$4 sm:$0xff]   ;;  %v1382_v35 = vld [vmem:[#allocation2 + $0x7c] ss:$12 sps:$4 sm:$0xff]  }
  0x1b   :  { %725 = vmatpush1.bf16.msra.mxu0 %v1365_v19  ;;  %v1392_v32 = vld [vmem:[#allocation2 + $0xc8] ss:$12 sps:$4 sm:$0xff]   ;;  %v1377_v34 = vld [vmem:[#allocation2 + $0x60] ss:$12 sps:$4 sm:$0xff]   ;;  %v1380_v36 = vld [vmem:[#allocation2 + $0x78] ss:$12 sps:$4 sm:$0xff]  }
  0x1c   :  { %v73_v16 = vcombine.high %v65_v12, %v65_v12  ;;  %v80_v17 = vsel %vm78_vm1, %v65_v12, 0  ;;  %v86_v24 = vsel %vm78_vm1, %v72_v18, 0  ;;  %726 = vmatprep.subr.bf16.mxu0 %v1370_v21  ;;  %v1393_v37 = vld [vmem:[#allocation2 + $0x8] ss:$12 sps:$4 sm:$0xff]   ;;  %v1397_v38 = vld [vmem:[#allocation2 + $0xe0] ss:$12 sps:$4 sm:$0xff]  }
  0x1d   :  { %v1385_v39 = vld [vmem:[#allocation2 + $0x94] ss:$12 sps:$4 sm:$0xff]   ;;  %v1383_v40 = vld [vmem:[#allocation2 + $0x90] ss:$12 sps:$4 sm:$0xff]   ;;  %v1388_v42 = vld [vmem:[#allocation2 + $0xac] ss:$12 sps:$4 sm:$0xff]  }
  0x1e   :  { %1159 = vmatprep.subr.msk.bf16.mxu1 %vm78_vm1, %v73_v16  ;;  %v1398_v41 = vld [vmem:[#allocation2 + $0x20] ss:$12 sps:$4 sm:$0xff]   ;;  %v1402_v43 = vld [vmem:[#allocation2 + $0xf8] ss:$12 sps:$4 sm:$0xff]   ;;  %v1386_v45 = vld [vmem:[#allocation2 + $0xa8] ss:$12 sps:$4 sm:$0xff]  }
  0x1f   :  { %89 = vmatpush1.bf16.msra.mxu1 %v80_v17  ;;  %727 = vmatpush1.bf16.msra.mxu0 %v1368_v25  ;;  %v1403_v44 = vld [vmem:[#allocation2 + $0x38] ss:$12 sps:$4 sm:$0xff]   ;;  %v1407_v46 = vld [vmem:[#allocation2 + $0x110] ss:$12 sps:$4 sm:$0xff]   ;;  %v1389_v49 = vld [vmem:[#allocation2 + $0xc0] ss:$12 sps:$4 sm:$0xff]  }
  0x20   :  { %1310 = vmatprep.subr.bf16.mxu1 %v1518_v23  ;;  %728 = vmatprep.subr.bf16.mxu0 %v1373_v26  ;;  %v1391_v47 = vld [vmem:[#allocation2 + $0xc4] ss:$12 sps:$4 sm:$0xff]   ;;  %v1412_v50 = vld [vmem:[#allocation2 + $0x128] ss:$12 sps:$4 sm:$0xff]   ;;  %v1406_v56 = vld [vmem:[#allocation2 + $0x10c] ss:$12 sps:$4 sm:$0xff]  }
  0x21   :  { %v1408_v48 = vld [vmem:[#allocation2 + $0x50] ss:$12 sps:$4 sm:$0xff]   ;;  %v1413_v52 = vld [vmem:[#allocation2 + $0x68] ss:$12 sps:$4 sm:$0xff]   ;;  %v1394_v53 = vld [vmem:[#allocation2 + $0xd8] ss:$12 sps:$4 sm:$0xff]  }
  0x22   :  { %1160 = vmatmul.mubr.msk.bf16.vlgmr.msra.gmra.mrb[0].mxu1 %vm74_vm3, %v55_v22  ;;  %v1396_v51 = vld [vmem:[#allocation2 + $0xdc] ss:$12 sps:$4 sm:$0xff]   ;;  %v1401_v54 = vld [vmem:[#allocation2 + $0xf4] ss:$12 sps:$4 sm:$0xff]   ;;  %v1411_v58 = vld [vmem:[#allocation2 + $0x124] ss:$12 sps:$4 sm:$0xff]  }
  0x23   :  { %1311 = vmatpush3.bf16.msra.mxu1 %v86_v24  ;;  %1312 = vmatprep.mubr.msk.bf16.mxu1 %vm1519_vm4, %v1518_v23  ;;  %v1399_v55 = vld [vmem:[#allocation2 + $0xf0] ss:$12 sps:$4 sm:$0xff]   ;;  %v1404_v57 = vld [vmem:[#allocation2 + $0x108] ss:$12 sps:$4 sm:$0xff]   ;;  %v1409_v59 = vld [vmem:[#allocation2 + $0x120] ss:$12 sps:$4 sm:$0xff]  }
  0x24   :  { %1316 = vmatprep.subr.bf16.mxu1 %v1518_v23  ;;  %729 = vmatpush1.bf16.msra.mxu0 %v1371_v28  ;;  %v1416_v60 = vld [vmem:[#allocation2 + $0x13c] ss:$12 sps:$4 sm:$0xff]   ;;  %v1417_v61 = vld [vmem:[#allocation2 + $0x140] ss:$12 sps:$4 sm:$0xff]   ;;  %v1414_v62 = vld [vmem:[#allocation2 + $0x138] ss:$12 sps:$4 sm:$0xff]  }
  0x25   :  { %730 = vmatprep.subr.bf16.mxu0 %v1376_v29  ;;  %v1418_v63 = vld [vmem:[#allocation2 + $0x80] ss:$12 sps:$4 sm:$0xff]   ;;  %v1419_v1 = vld [vmem:[#allocation2 + $0x150] ss:$12 sps:$4 sm:$0xff]   ;;  %v1422_v2 = vld [vmem:[#allocation2 + $0x158] ss:$12 sps:$4 sm:$0xff]  }
  0x26   :  { %v1421_v0 = vld [vmem:[#allocation2 + $0x154] ss:$12 sps:$4 sm:$0xff]   ;;  %v1423_v5 = vld [vmem:[#allocation2 + $0x98] ss:$12 sps:$4 sm:$0xff]   ;;  %v1427_v7 = vld [vmem:[#allocation2 + $0x170] ss:$12 sps:$4 sm:$0xff]  }
  0x27   :  { %v1426_v6 = vld [vmem:[#allocation2 + $0x16c] ss:$12 sps:$4 sm:$0xff]   ;;  %v1424_v8 = vld [vmem:[#allocation2 + $0x168] ss:$12 sps:$4 sm:$0xff]   ;;  %v1428_v9 = vld [vmem:[#allocation2 + $0xb0] ss:$12 sps:$4 sm:$0xff]  }
  0x28   :  { %731 = vmatpush1.bf16.msra.mxu0 %v1374_v31  ;;  %v1431_v10 = vld [vmem:[#allocation2 + $0x184] ss:$12 sps:$4 sm:$0xff]   ;;  %v281_v11 = vsub.s32 0, %v1583_v3  ;;  %v277_v12 = vld [vmem:[%s1738_s4] sm:$0x7]  ;;  %vm720_vm5 = vcmask 523264  }
  0x29   :  { %732 = vmatprep.subr.bf16.mxu0 %v1379_v33  ;;  %v286_v19 = vrot.slane %v277_v12, %v285_v13  ;;  %v1429_v33 = vld [vmem:[#allocation2 + $0x180] ss:$12 sps:$4 sm:$0xff]   ;;  %s1520_s5 = smov [#allocation5]   ;;  %vm1142_vm6 = vcmask 80896  }
  0x2a   :  { %1313 = vmatmul.mubr.msk.bf16.vlgmr.msra.gmra.mrb[4].mxu1 %vm74_vm3, %v55_v22  ;;  %v282_v16 = vrot.slane %v277_v12, %v281_v11  ;;  %s1150_s25 = sshll.u32 %s1520_s5, 4  ;;  %s1151_s25 = int_to_ptr.vmem [resolvable:$true] %s1150_s25 }
  0x2b   :  { %1317 = vmatpush3.bf16.msra.mxu1 %v194_v30  ;;  %1318 = vmatprep.mubr.msk.bf16.mxu1 %vm1519_vm4, %v1518_v23  ;;  %s1487_s26 = scalar_lea.vmem %s1151_s25, 128  ;;  %p1492_p9 = scmp.lt.s32.totalorder %s1151_s25, %s1151_s25 }
  0x2c   :  { %1256 = vmatprep.subr.bf16.mxu1 %v1392_v32  ;;  %733 = vmatpush1.bf16.msra.mxu0 %v1377_v34  ;;  %v1432_v34 = vld [vmem:[#allocation2 + $0x188] ss:$12 sps:$4 sm:$0xff]   ;;  %p1488_p8 = scmp.ne.s32.totalorder %s1151_s25, %s1487_s26  ;;  %p1493_p10 = scmp.lt.s32.totalorder %s1487_s26, %s1487_s26 }
  0x2d   :  { %734 = vmatprep.subr.bf16.mxu0 %v1382_v35 }
  0x2e   :  { %p1494_p11 = por %p1493_p10, %p1492_p9 }
  0x30   :  { %735 = vmatpush1.bf16.msra.mxu0 %v1380_v36  ;;  %p1495_p12 = pnand %p1494_p11, %p1488_p8 }
  0x31   :  { %736 = vmatprep.subr.bf16.mxu0 %v1385_v39 }
  0x32   :  { %1319 = vmatmul.mubr.msk.bf16.vlgmr.msra.gmra.mrb[8].mxu1 %vm182_vm2, %v49_v14 }
  0x33   :  { %1257 = vmatpush3.bf16.msra.mxu1 %v1393_v37  ;;  %v1435_v37 = vld [vmem:[#allocation2 + $0x19c] ss:$12 sps:$4 sm:$0xff]  }
  0x34   :  { %1258 = vmatprep.subr.bf16.mxu1 %v1397_v38  ;;  %737 = vmatpush1.bf16.msra.mxu0 %v1383_v40  ;;  %v289_v40 = vsub.s32 2, %v1583_v3 }
  0x35   :  { %738 = vmatprep.subr.bf16.mxu0 %v1388_v42  ;;  %v1436_v42 = vld [vmem:[#allocation2 + $0x1a0] ss:$12 sps:$4 sm:$0xff]  }
  0x37   :  { %1259 = vmatpush3.bf16.msra.mxu1 %v1398_v41  ;;  %v1433_v41 = vld [vmem:[#allocation2 + $0x198] ss:$12 sps:$4 sm:$0xff]  }
  0x38   :  { %1260 = vmatprep.subr.bf16.mxu1 %v1402_v43  ;;  %739 = vmatpush1.bf16.msra.mxu0 %v1386_v45  ;;  %v1439_v43 = vld [vmem:[#allocation2 + $0x1b4] ss:$12 sps:$4 sm:$0xff]  }
  0x39   :  { %740 = vmatprep.subr.bf16.mxu0 %v1391_v47  ;;  %v1440_v47 = vld [vmem:[#allocation2 + $0x1b8] ss:$12 sps:$4 sm:$0xff]  }
  0x3b   :  { %1261 = vmatpush3.bf16.msra.mxu1 %v1403_v44  ;;  %v290_v44 = vrot.slane %v277_v12, %v289_v40  ;;  %v1461_v12 = vld [vmem:[%s1741_s7 + $0x30] sm:$0xff]  }
  0x3c   :  { %1262 = vmatprep.subr.bf16.mxu1 %v1407_v46  ;;  %741 = vmatpush1.bf16.msra.mxu0 %v1389_v49  ;;  %v1437_v46 = vld [vmem:[#allocation2 + $0x1b0] ss:$12 sps:$4 sm:$0xff]  }
  0x3d   :  { %742 = vmatprep.subr.bf16.mxu0 %v1396_v51 }
  0x3f   :  { %1263 = vmatpush3.bf16.msra.mxu1 %v1408_v48 }
  0x40   :  { %1264 = vmatprep.subr.bf16.mxu1 %v1412_v50  ;;  %743 = vmatpush1.bf16.msra.mxu0 %v1394_v53  ;;  %v1443_v50 = vld [vmem:[#allocation2 + $0x1cc] ss:$12 sps:$4 sm:$0xff]   ;;  %v1441_v53 = vld [vmem:[#allocation2 + $0x1c8] ss:$12 sps:$4 sm:$0xff]  }
  0x41   :  { %744 = vmatprep.subr.bf16.mxu0 %v1401_v54  ;;  %v1444_v54 = vld [vmem:[#allocation2 + $0x1d0] ss:$12 sps:$4 sm:$0xff]  }
  0x43   :  { %1265 = vmatpush3.bf16.msra.mxu1 %v1413_v52 }
  0x44   :  { %745 = vmatpush1.bf16.msra.mxu0 %v1399_v55  ;;  %1266 = vmatprep.subr.bf16.mxu1 %v1417_v61  ;;  %v1449_v61 = vld [vmem:[%s1741_s7 + $0x50] sm:$0xff]  }
  0x45   :  { %746 = vmatprep.subr.bf16.mxu0 %v1406_v56  ;;  %v1445_v56 = vld [vmem:[%s1741_s7 + $0x40] sm:$0xff]  }
  0x47   :  { %1267 = vmatpush3.bf16.msra.mxu1 %v1418_v63  ;;  %v1451_v63 = vld [vmem:[%s1741_s7 + $0x58] sm:$0xff]  }
  0x48   :  { %747 = vmatpush1.bf16.msra.mxu0 %v1404_v57  ;;  %1268 = vmatprep.subr.bf16.mxu1 %v1422_v2  ;;  %v1454_v2 = vld [vmem:[%s1741_s7 + $0x60] sm:$0xff]  }
  0x49   :  { %748 = vmatprep.subr.bf16.mxu0 %v1411_v58  ;;  %v1446_v58 = vld [vmem:[%s1741_s7] sm:$0xff]  }
  0x4b   :  { %1269 = vmatpush3.bf16.msra.mxu1 %v1423_v5  ;;  %v1456_v5 = vld [vmem:[%s1741_s7 + $0x88] sm:$0xff]  }
  0x4c   :  { %749 = vmatpush1.bf16.msra.mxu0 %v1409_v59  ;;  %1270 = vmatprep.subr.bf16.mxu1 %v1427_v7  ;;  %v1447_v59 = vld [vmem:[%s1741_s7 + $0x48] sm:$0xff]  }
  0x4d   :  { %750 = vmatprep.subr.bf16.mxu0 %v1416_v60  ;;  %v1448_v60 = vld [vmem:[%s1741_s7 + $0x8] sm:$0xff]  }
  0x4e   :  { %v1457_v7 = vld [vmem:[%s1741_s7 + $0x68] sm:$0xff]  }
  0x4f   :  { %1271 = vmatpush3.bf16.msra.mxu1 %v1428_v9  ;;  %v1459_v9 = vld [vmem:[%s1741_s7 + $0x90] sm:$0xff]  }
  0x50   :  { %751 = vmatpush1.bf16.msra.mxu0 %v1414_v62  ;;  %1322 = vmatprep.subr.bf16.mxu1 %v1518_v23  ;;  %v1450_v62 = vld [vmem:[%s1741_s7 + $0x10] sm:$0xff]  }
  0x51   :  { %752 = vmatprep.subr.bf16.mxu0 %v1421_v0  ;;  %v1452_v0 = vld [vmem:[%s1741_s7 + $0x18] sm:$0xff]  }
  0x54   :  { %753 = vmatpush1.bf16.msra.mxu0 %v1419_v1  ;;  %v1453_v1 = vld [vmem:[%s1741_s7 + $0x80] sm:$0xff]  }
  0x55   :  { %754 = vmatprep.subr.bf16.mxu0 %v1426_v6  ;;  %v1455_v6 = vld [vmem:[%s1741_s7 + $0x20] sm:$0xff]  }
  0x58   :  { %755 = vmatpush1.bf16.msra.mxu0 %v1424_v8  ;;  %v1458_v8 = vld [vmem:[%s1741_s7 + $0x28] sm:$0xff]  }
  0x59   :  { %765 = vmatprep.subr.bf16.mxu0 %v1431_v10  ;;  %v1460_v10 = vld [vmem:[%s1741_s7 + $0x70] sm:$0xff]  }
  0xed   :  { %v230_v14 = vpop.f32.mrb[0].mxu0 }
  0xee   :  { %v232_v15 = vpop.f32.mrb[1].mxu0 }
  0xef   :  { %v234_v17 = vpop.f32.mrb[2].mxu0 }
  0xf0   :  { %v235_v20 = vpop.f32.mrb[3].mxu0 }
  0xf5   :  { %v122_v18 = vpop.f32.mrb[0].mxu1 }
  0xf6   :  { %v231_v21 = vadd.f32 %v230_v14, %v122_v18  ;;  %v124_v22 = vpop.f32.mrb[1].mxu1  ;;  %v1462_v14 = vld [vmem:[%s1741_s7 + $0x98] sm:$0xff]  }
  0xf7   :  { %v233_v24 = vadd.f32 %v232_v15, %v124_v22  ;;  %v126_v25 = vpop.f32.mrb[2].mxu1  ;;  %v1463_v15 = vld [vmem:[%s1741_s7 + $0x78] sm:$0xff]  }
  0xf8   :  { %v294_v26 = vadd.f32 %v282_v16, %v231_v21  ;;  %v127_v27 = vpop.f32.mrb[3].mxu1  ;;  %v1464_v16 = vld [vmem:[%s1741_s7 + $0x38] sm:$0xff]   ;;  %v383_v21 = vld [vmem:[%s1740_s6] sm:$0x7] }
  0xf9   :  { %v295_v28 = vadd.f32 %v286_v19, %v233_v24  ;;  %v396_v22 = vrot.slane %v383_v21, %v289_v40  ;;  %v388_v24 = vrot.slane %v383_v21, %v281_v11  ;;  %v392_v25 = vrot.slane %v383_v21, %v285_v13 }
  0xfa   :  { %v297_v29 = vmax.f32 %v294_v26, 0.0 }
  0xfb   :  { %v298_v30 = vmax.f32 %v295_v28, 0.0 }
  0xfc   :  { %v300_v35 = vpack.c.bf16 %v297_v29, %v297_v29 }
  0xfd   :  { %v301_v31 = vpack.c.bf16 %v298_v30, %v298_v30  ;;  %v163_v32 = vpop.f32.mrb[4].mxu1 }
  0xfe   :  { %v1314_v36 = vpop.f32.mrb[5].mxu1 }
  0xff   :  { %v166_v38 = vpop.f32.mrb[6].mxu1  ;;  %756 = vmatprep.mubr.bf16.mxu0 %v301_v31  ;;  %838 = vmatprep.mubr.bf16.mxu1 %v301_v31 }
 0x100   :  { %v1315_v39 = vpop.f32.mrb[7].mxu1  ;;  %757 = vmatmul.mubr.bf16.vlgmr.msra.gmra.mrb[4].mxu0 %v300_v35  ;;  %839 = vmatmul.mubr.bf16.vlgmr.msra.gmra.mrb[12].mxu1 %v300_v35 }
 0x101   :  { %766 = vmatpush1.bf16.msra.mxu0 %v1429_v33  ;;  %1323 = vmatpush3.bf16.msra.mxu1 %v1432_v34 }
 0x102   :  { %767 = vmatprep.subr.bf16.mxu0 %v1435_v37  ;;  %1324 = vmatprep.subr.bf16.mxu1 %v1518_v23 }
 0x103   :  { %797 = vmatprep.mubr.bf16.mxu0 %v1517_v4  ;;  %1330 = vmatprep.mubr.msk.bf16.mxu1 %vm1519_vm4, %v1518_v23 }
 0x105   :  { %768 = vmatpush1.bf16.msra.mxu0 %v1433_v41  ;;  %1325 = vmatpush3.bf16.msra.mxu1 %v1436_v42  ;;  %v271_v45 = vpop.f32.mrb[8].mxu1 }
 0x106   :  { %v272_v48 = vadd.f32 %v271_v45, %v163_v32  ;;  %v1320_v49 = vpop.f32.mrb[9].mxu1  ;;  %769 = vmatprep.subr.bf16.mxu0 %v1439_v43  ;;  %1326 = vmatprep.subr.bf16.mxu1 %v1518_v23  ;;  %v1230_v45 = vld [vmem:[%s1742_s8] ss:$0 sm:$0xff] }
 0x107   :  { %v274_v51 = vpop.f32.mrb[10].mxu1 }
 0x108   :  { %v296_v52 = vadd.f32 %v290_v44, %v272_v48  ;;  %v1321_v4 = vpop.f32.mrb[11].mxu1 }
 0x109   :  { %770 = vmatpush1.bf16.msra.mxu0 %v1437_v46  ;;  %1327 = vmatpush3.bf16.msra.mxu1 %v1440_v47 }
 0x10a   :  { %v299_v55 = vmax.f32 %v296_v52, 0.0  ;;  %771 = vmatprep.subr.bf16.mxu0 %v1443_v50  ;;  %1328 = vmatprep.subr.bf16.mxu1 %v1518_v23 }
 0x10c   :  { %v302_v57 = vpack.c.bf16 %v299_v55, %v299_v55 }
 0x10d   :  { %772 = vmatpush1.bf16.msra.mxu0 %v1441_v53  ;;  %1329 = vmatpush3.bf16.msra.mxu1 %v1444_v54 }
 0x10e   :  { %1283 = vmatprep.subr.bf16.mxu1 %v1445_v56  ;;  %1334 = vmatprep.subr.bf16.mxu0 %v1518_v23 }
 0x110   :  { %1228 = vmatmul.mubr.msk.bf16.vlgmr.msra.gmra.mrb[4].mxu0 %vm720_vm5, %v302_v57  ;;  %1331 = vmatmul.mubr.msk.bf16.vlgmr.msra.gmra.mrb[16].mxu1 %vm720_vm5, %v302_v57 }
 0x111   :  { %1284 = vmatpush3.bf16.msra.mxu1 %v1446_v58  ;;  %1342 = vmatprep.mubr.msk.bf16.mxu0 %vm1519_vm4, %v1518_v23 }
 0x112   :  { %1285 = vmatprep.subr.bf16.mxu1 %v1447_v59  ;;  %1335 = vmatpush3.bf16.msra.mxu0 %v1453_v1 }
 0x113   :  { %1336 = vmatprep.subr.bf16.mxu0 %v1518_v23 }
 0x115   :  { %1286 = vmatpush3.bf16.msra.mxu1 %v1448_v60 }
 0x116   :  { %1287 = vmatprep.subr.bf16.mxu1 %v1449_v61  ;;  %1337 = vmatpush3.bf16.msra.mxu0 %v1456_v5 }
 0x117   :  { %1338 = vmatprep.subr.bf16.mxu0 %v1518_v23 }
 0x119   :  { %1288 = vmatpush3.bf16.msra.mxu1 %v1450_v62 }
 0x11a   :  { %1289 = vmatprep.subr.bf16.mxu1 %v1451_v63  ;;  %1339 = vmatpush3.bf16.msra.mxu0 %v1459_v9 }
 0x11b   :  { %1340 = vmatprep.subr.bf16.mxu0 %v1518_v23 }
 0x11d   :  { %1290 = vmatpush3.bf16.msra.mxu1 %v1452_v0 }
 0x11e   :  { %1291 = vmatprep.subr.bf16.mxu1 %v1454_v2  ;;  %1341 = vmatpush3.bf16.msra.mxu0 %v1462_v14 }
 0x121   :  { %1292 = vmatpush3.bf16.msra.mxu1 %v1455_v6 }
 0x122   :  { %1293 = vmatprep.subr.bf16.mxu1 %v1457_v7 }
 0x125   :  { %1294 = vmatpush3.bf16.msra.mxu1 %v1458_v8 }
 0x126   :  { %1295 = vmatprep.subr.bf16.mxu1 %v1460_v10 }
 0x129   :  { %1296 = vmatpush3.bf16.msra.mxu1 %v1461_v12 }
 0x12a   :  { %1297 = vmatprep.subr.bf16.mxu1 %v1463_v15 }
 0x12d   :  { %1298 = vmatpush3.bf16.msra.mxu1 %v1464_v16 }
 0x1d3   :  { %v1272_v17 = vpop.f32.mrb[12].mxu1 }
 0x1d4   :  { %v1273_v18 = vpop.f32.mrb[13].mxu1 }
 0x1d5   :  { %v1274_v19 = vadd.f32 %v1273_v18, %v1272_v17  ;;  %v1275_v23 = vpop.f32.mrb[14].mxu1 }
 0x1d6   :  { %v1276_v20 = vpop.f32.mrb[15].mxu1 }
 0x1d7   :  { %v841_v26 = vadd.f32 %v1274_v19, %v396_v22 }
 0x1e3   :  { %v799_v27 = vpop.f32.mrb[4].mxu0  ;;  %v880_v28 = vpop.f32.mrb[16].mxu1 }
 0x1e4   :  { %v1346_v29 = vadd.f32 %v799_v27, %v388_v24  ;;  %v881_v30 = vadd.f32 %v880_v28, %v841_v26  ;;  %v801_v31 = vpop.f32.mrb[5].mxu0  ;;  %v1332_v32 = vpop.f32.mrb[17].mxu1 }
 0x1e5   :  { %v1347_v33 = vadd.f32 %v801_v31, %v392_v25  ;;  %v803_v34 = vpop.f32.mrb[6].mxu0  ;;  %v883_v35 = vpop.f32.mrb[18].mxu1 }
 0x1e6   :  { %v886_v36 = vmax.f32 %v1346_v29, 0.0  ;;  %v888_v37 = vmax.f32 %v881_v30, 0.0  ;;  %v804_v38 = vpop.f32.mrb[7].mxu0  ;;  %v1333_v39 = vpop.f32.mrb[19].mxu1 }
 0x1e7   :  { %v887_v40 = vmax.f32 %v1347_v33, 0.0 }
 0x1e8   :  { %v891_v41 = vpack.c.bf16 %v888_v37, %v888_v37  ;;  %v889_v42 = vpack.c.bf16 %v886_v36, %v886_v36 }
 0x1e9   :  { %v890_v11 = vpack.c.bf16 %v887_v40, %v887_v40 }
 0x1ea   :  { %1343 = vmatmul.mubr.msk.bf16.vlgmr.msra.gmra.mrb[8].mxu0 %vm720_vm5, %v891_v41 }
 0x1eb   :  { %1094 = vmatprep.mubr.bf16.mxu1 %v890_v11 }
 0x1ec   :  { %1095 = vmatmul.mubr.bf16.vlgmr.msra.gmra.mrb[20].mxu1 %v889_v42 }
 0x2bd   :  { %v1136_v3 = vpop.f32.mrb[8].mxu0 }
 0x2be   :  { %v1344_v13 = vpop.f32.mrb[9].mxu0 }
 0x2bf   :  { %v1299_v43 = vpop.f32.mrb[20].mxu1  ;;  %v1139_v44 = vpop.f32.mrb[10].mxu0 }
 0x2c0   :  { %v1300_v46 = vpop.f32.mrb[21].mxu1  ;;  %v1345_v47 = vpop.f32.mrb[11].mxu0 }
 0x2c1   :  { %v1301_v48 = vadd.f32 %v1300_v46, %v1299_v43  ;;  %v1302_v49 = vpop.f32.mrb[22].mxu1 }
 0x2c2   :  { %v1303_v50 = vpop.f32.mrb[23].mxu1 }
 0x2c3   :  { %v1097_v51 = vadd.f32 %v1301_v48, %v1230_v45 }
 0x2c5   :  { %v1137_v52 = vadd.f32 %v1136_v3, %v1097_v51 }
 0x2c7   :  { %1143 = vst.msk [vmem:[#allocation5] sm:$0xff] %vm1142_vm6, %v1137_v52 }
 0x2c8   :  { %1498 = shalt.err (!%p1495_p12)
}
 0x2c9   :  { %s1499_s28 = scalar_lea.hbm %s1743_s9, 128 }
 0x2ca   :  { %p1500_p13 = scmp.ne.s32.totalorder %s1743_s9, %s1499_s28  ;;  %p1503_p0 = scmp.lt.u32.totalorder %s1499_s28, %s1743_s9 }
 0x2cc   :  { %p1505_p1 = pnand %p1503_p0, %p1500_p13 }
 0x2ce   :  { %1508 = shalt.err (!%p1505_p1)
}
 0x2cf   :  { %1153 = dma.vmem_to_hbm [thread:$0]  %s1151_s25, 128, %s1743_s9, [#allocation4]  }
 0x2d0   :  { %1511 = dma.done.wait [#allocation4], 128  }
 0x2d1   :  { %1512 = vsyncadd [#allocation4], 4294967168 }
 0x2d2   :  { %1157 = vsyncpa [#allocation3], 1 }
 0x2d3   :  { %1158 = vsyncpa [#allocation4], 1 }

</bundles_post_ra>
